<compile_context>
chip_gen: v7x
topology: tpu7x:2x2x1
jax: 0.10.0
libtpu: 0.0.40
codegen_flags: <defaults>
</compile_context>

<pallas_src>
import jax
import jax.numpy as jnp
from jax.experimental import pallas as pl
from jax.experimental.pallas import tpu as pltpu

_LANE = 128      # TPU vreg lane width
_SUBLANE = 8     # f32 sublane count


def _round_up(x, m):
    return (x + m - 1) // m * m


def actor_kernel(x_ref, w1_ref, b1_ref, w2_ref, b2_ref, w3_ref, b3_ref, o_ref):
    """Fused 3-layer MLP forward for one (TB, state_size) batch tile."""
    x = x_ref[...]

    # Layer 1: Linear + ReLU
    h1 = jnp.dot(x, w1_ref[...], preferred_element_type=jnp.float32) + b1_ref[...]
    h1 = jnp.maximum(h1, 0.0)

    # Layer 2: Linear + ReLU
    h2 = jnp.dot(h1, w2_ref[...], preferred_element_type=jnp.float32) + b2_ref[...]
    h2 = jnp.maximum(h2, 0.0)

    # Output layer: Linear + tanh, written to a lane-dense (TB, 128k) slab.
    out = jnp.dot(h2, w3_ref[...], preferred_element_type=jnp.float32) + b3_ref[...]
    o_ref[...] = jnp.tanh(out).astype(o_ref.dtype)


def actor_forward(state, params, *, batch_tile=1024):
    """state: (B, state_size) float32; params: dict of (in, out) weights / (1, out) biases."""
    w1, b1 = params["w1"], params["b1"]
    w2, b2 = params["w2"], params["b2"]
    w3, b3 = params["w3"], params["b3"]

    B, S = state.shape
    H1 = w1.shape[1]
    H2 = w2.shape[1]
    A = w3.shape[1]

    # ---- Lane-dense output slab: pad the action dim up to a multiple of 128.
    Np = _round_up(A, _LANE)
    if Np != A:
        w3p = jnp.pad(w3, ((0, 0), (0, Np - A)))
        b3p = jnp.pad(b3, ((0, 0), (0, Np - A)))
    else:
        w3p, b3p = w3, b3

    # ---- Batch tiling (multiple of 8 for the f32 sublane rule).
    TB = min(int(batch_tile), _round_up(B, _SUBLANE))
    TB = _round_up(TB, _SUBLANE)
    Bp = _round_up(B, TB)
    xp = jnp.pad(state, ((0, Bp - B), (0, 0))) if Bp != B else state

    grid = (Bp // TB,)

    # Weights/biases: block index is constant across the grid -> stay resident
    # in VMEM (no re-DMA after the first grid step).
    def resident(shape):
        return pl.BlockSpec(shape, lambda i: (0, 0))

    # Advisory cost estimate so XLA schedules the custom call sensibly when it
    # is embedded in a larger RL step.
    flops = 2 * Bp * (S * H1 + H1 * H2 + H2 * Np)
    bytes_accessed = 4 * (
        Bp * S + Bp * Np                               # activations in/out
        + S * H1 + H1 + H1 * H2 + H2 + H2 * Np + Np    # weights + biases
    )
    cost = pl.CostEstimate(
        flops=flops,
        transcendentals=Bp * Np,   # tanh
        bytes_accessed=bytes_accessed,
    )

    out_padded = pl.pallas_call(
        actor_kernel,
        out_shape=jax.ShapeDtypeStruct((Bp, Np), jnp.float32),
        grid_spec=pltpu.PrefetchScalarGridSpec(
            num_scalar_prefetch=0,
            grid=grid,
            in_specs=[
                pl.BlockSpec((TB, S), lambda i: (i, 0)),   # state tile (streamed)
                resident((S, H1)), resident((1, H1)),      # layer 1 (resident)
                resident((H1, H2)), resident((1, H2)),     # layer 2 (resident)
                resident((H2, Np)), resident((1, Np)),     # layer 3 (resident, lane-padded)
            ],
            out_specs=pl.BlockSpec((TB, Np), lambda i: (i, 0)),
        ),
        compiler_params=pltpu.CompilerParams(
            dimension_semantics=("parallel",),             # split batch across TCs (v7x)
        ),
        cost_estimate=cost,
    )(xp, w1, b1, w2, b2, w3p, b3p)

    # Strip batch padding and the lane-padding of the action dim.
    return out_padded[:B, :A]


def init_actor_params(key, state_size, action_size, first_hidden_size,
                      second_hidden_size):
    """Deterministic PyTorch-style (uniform +-1/sqrt(fan_in)) init.

    Weights stored as (in_features, out_features) for direct `x @ W`.
    """
    def linear_init(k, fan_in, fan_out):
        kw, kb = jax.random.split(k)
        bound = 1.0 / jnp.sqrt(fan_in)
        w = jax.random.uniform(kw, (fan_in, fan_out), jnp.float32, -bound, bound)
        b = jax.random.uniform(kb, (1, fan_out), jnp.float32, -bound, bound)
        return w, b

    k1, k2, k3 = jax.random.split(key, 3)
    w1, b1 = linear_init(k1, state_size, first_hidden_size)
    w2, b2 = linear_init(k2, first_hidden_size, second_hidden_size)
    w3, b3 = linear_init(k3, second_hidden_size, action_size)
    return {"w1": w1, "b1": b1, "w2": w2, "b2": b2, "w3": w3, "b3": b3}


def actor_reference(state, params):
    """Pure-JAX reference for correctness checking."""
    h1 = jnp.maximum(state @ params["w1"] + params["b1"], 0.0)
    h2 = jnp.maximum(h1 @ params["w2"] + params["b2"], 0.0)
    return jnp.tanh(h2 @ params["w3"] + params["b3"])


if __name__ == "__main__":
    key = jax.random.PRNGKey(0)
    k_params, k_state = jax.random.split(key)

    # Small shapes consistent with the module: batch=8, state=16,
    # hidden sizes 32 and 32, actions=8.
    batch, state_size, action_size = 8, 16, 8
    first_hidden_size, second_hidden_size = 32, 32

    params = init_actor_params(k_params, state_size, action_size,
                               first_hidden_size, second_hidden_size)
    state = jax.random.normal(k_state, (batch, state_size), jnp.float32)

    out = actor_forward(state, params)
    out = jax.block_until_ready(out)

    ref = actor_reference(state, params)
    assert out.shape == (batch, action_size)
    assert jnp.allclose(out, ref, atol=1e-5, rtol=1e-5), "mismatch vs reference"

    # Also exercise a multi-tile batch path (grid > 1) to validate the
    # streaming / resident-weight design.
    big_state = jax.random.normal(jax.random.PRNGKey(1), (2048 + 40, state_size),
                                  jnp.float32)
    big_out = jax.block_until_ready(actor_forward(big_state, params))
    big_ref = actor_reference(big_state, params)
    assert big_out.shape == big_ref.shape
    assert jnp.allclose(big_out, big_ref, atol=1e-5, rtol=1e-5), "mismatch (big batch)"

    print("KERNEL_OK")
</pallas_src>

<mosaic_0001>
module attributes {stable_mosaic.version = 11 : i64} {
  func.func @actor_kernel(%arg0: i32, %arg1: memref<8x16xf32, #tpu.memory_space<vmem>>, %arg2: memref<16x32xf32, #tpu.memory_space<vmem>>, %arg3: memref<1x32xf32, #tpu.memory_space<vmem>>, %arg4: memref<32x32xf32, #tpu.memory_space<vmem>>, %arg5: memref<1x32xf32, #tpu.memory_space<vmem>>, %arg6: memref<32x128xf32, #tpu.memory_space<vmem>>, %arg7: memref<1x128xf32, #tpu.memory_space<vmem>>, %arg8: memref<8x128xf32, #tpu.memory_space<vmem>>) attributes {dimension_semantics = [#tpu.dimension_semantics<parallel>], iteration_bounds = array<i64: 1>, scalar_prefetch = 0 : i64, scratch_operands = 0 : i64, tpu.core_type = #tpu.core_type<tc>, window_params = [{transform_indices = @transform_0, window_bounds = array<i64: 8, 16>}, {pipeline_mode = #tpu.pipeline_mode<synchronous>, transform_indices = @transform_1, window_bounds = array<i64: 16, 32>}, {pipeline_mode = #tpu.pipeline_mode<synchronous>, transform_indices = @transform_2, window_bounds = array<i64: 1, 32>}, {pipeline_mode = #tpu.pipeline_mode<synchronous>, transform_indices = @transform_3, window_bounds = array<i64: 32, 32>}, {pipeline_mode = #tpu.pipeline_mode<synchronous>, transform_indices = @transform_4, window_bounds = array<i64: 1, 32>}, {pipeline_mode = #tpu.pipeline_mode<synchronous>, transform_indices = @transform_5, window_bounds = array<i64: 32, 128>}, {pipeline_mode = #tpu.pipeline_mode<synchronous>, transform_indices = @transform_6, window_bounds = array<i64: 1, 128>}, {transform_indices = @transform_7, window_bounds = array<i64: 8, 128>}]} {
    %c0 = arith.constant 0 : index
    %c0_0 = arith.constant 0 : index
    %0 = vector.load %arg1[%c0, %c0_0] : memref<8x16xf32, #tpu.memory_space<vmem>>, vector<8x16xf32>
    %c0_1 = arith.constant 0 : index
    %c0_2 = arith.constant 0 : index
    %1 = vector.load %arg2[%c0_1, %c0_2] : memref<16x32xf32, #tpu.memory_space<vmem>>, vector<16x32xf32>
    %cst = arith.constant dense<0.000000e+00> : vector<8x32xf32>
    %2 = tpu.matmul %0, %1, %cst {dimension_numbers = #tpu.dot_dimension_numbers<[1], [0], [0], [1], [0, 0, 1, 1], [], []>} : vector<8x16xf32>, vector<16x32xf32>, vector<8x32xf32> -> vector<8x32xf32>
    %c0_3 = arith.constant 0 : index
    %c0_4 = arith.constant 0 : index
    %3 = vector.load %arg3[%c0_3, %c0_4] : memref<1x32xf32, #tpu.memory_space<vmem>>, vector<1x32xf32>
    %4 = vector.broadcast %3 : vector<1x32xf32> to vector<8x32xf32>
    %5 = arith.addf %2, %4 : vector<8x32xf32>
    %cst_5 = arith.constant 0.000000e+00 : f32
    %6 = vector.broadcast %cst_5 : f32 to vector<8x32xf32>
    %7 = arith.maximumf %5, %6 : vector<8x32xf32>
    %c0_6 = arith.constant 0 : index
    %c0_7 = arith.constant 0 : index
    %8 = vector.load %arg4[%c0_6, %c0_7] : memref<32x32xf32, #tpu.memory_space<vmem>>, vector<32x32xf32>
    %cst_8 = arith.constant dense<0.000000e+00> : vector<8x32xf32>
    %9 = tpu.matmul %7, %8, %cst_8 {dimension_numbers = #tpu.dot_dimension_numbers<[1], [0], [0], [1], [0, 0, 1, 1], [], []>} : vector<8x32xf32>, vector<32x32xf32>, vector<8x32xf32> -> vector<8x32xf32>
    %c0_9 = arith.constant 0 : index
    %c0_10 = arith.constant 0 : index
    %10 = vector.load %arg5[%c0_9, %c0_10] : memref<1x32xf32, #tpu.memory_space<vmem>>, vector<1x32xf32>
    %11 = vector.broadcast %10 : vector<1x32xf32> to vector<8x32xf32>
    %12 = arith.addf %9, %11 : vector<8x32xf32>
    %cst_11 = arith.constant 0.000000e+00 : f32
    %13 = vector.broadcast %cst_11 : f32 to vector<8x32xf32>
    %14 = arith.maximumf %12, %13 : vector<8x32xf32>
    %c0_12 = arith.constant 0 : index
    %c0_13 = arith.constant 0 : index
    %15 = vector.load %arg6[%c0_12, %c0_13] : memref<32x128xf32, #tpu.memory_space<vmem>>, vector<32x128xf32>
    %cst_14 = arith.constant dense<0.000000e+00> : vector<8x128xf32>
    %16 = tpu.matmul %14, %15, %cst_14 {dimension_numbers = #tpu.dot_dimension_numbers<[1], [0], [0], [1], [0, 0, 1, 1], [], []>} : vector<8x32xf32>, vector<32x128xf32>, vector<8x128xf32> -> vector<8x128xf32>
    %c0_15 = arith.constant 0 : index
    %c0_16 = arith.constant 0 : index
    %17 = vector.load %arg7[%c0_15, %c0_16] : memref<1x128xf32, #tpu.memory_space<vmem>>, vector<1x128xf32>
    %18 = vector.broadcast %17 : vector<1x128xf32> to vector<8x128xf32>
    %19 = arith.addf %16, %18 : vector<8x128xf32>
    %20 = math.tanh %19 : vector<8x128xf32>
    %c0_17 = arith.constant 0 : index
    %c0_18 = arith.constant 0 : index
    %21 = vector.load %arg8[%c0_17, %c0_18] : memref<8x128xf32, #tpu.memory_space<vmem>>, vector<8x128xf32>
    tpu.vector_store %arg8[%c0_17, %c0_18], %20 {strides = array<i32>} : memref<8x128xf32, #tpu.memory_space<vmem>>, vector<8x128xf32>,
    return
  }
  func.func @transform_0(%arg0: i32) -> (i32, i32) {
    %c0_i32 = arith.constant 0 : i32
    %c0_i32_0 = arith.constant 0 : i32
    return %arg0, %c0_i32 : i32, i32
  }
  func.func @transform_1(%arg0: i32) -> (i32, i32) {
    %c0_i32 = arith.constant 0 : i32
    %c0_i32_0 = arith.constant 0 : i32
    %c0_i32_1 = arith.constant 0 : i32
    return %c0_i32, %c0_i32_0 : i32, i32
  }
  func.func @transform_2(%arg0: i32) -> (i32, i32) {
    %c0_i32 = arith.constant 0 : i32
    %c0_i32_0 = arith.constant 0 : i32
    %c0_i32_1 = arith.constant 0 : i32
    return %c0_i32, %c0_i32_0 : i32, i32
  }
  func.func @transform_3(%arg0: i32) -> (i32, i32) {
    %c0_i32 = arith.constant 0 : i32
    %c0_i32_0 = arith.constant 0 : i32
    %c0_i32_1 = arith.constant 0 : i32
    return %c0_i32, %c0_i32_0 : i32, i32
  }
  func.func @transform_4(%arg0: i32) -> (i32, i32) {
    %c0_i32 = arith.constant 0 : i32
    %c0_i32_0 = arith.constant 0 : i32
    %c0_i32_1 = arith.constant 0 : i32
    return %c0_i32, %c0_i32_0 : i32, i32
  }
  func.func @transform_5(%arg0: i32) -> (i32, i32) {
    %c0_i32 = arith.constant 0 : i32
    %c0_i32_0 = arith.constant 0 : i32
    %c0_i32_1 = arith.constant 0 : i32
    return %c0_i32, %c0_i32_0 : i32, i32
  }
  func.func @transform_6(%arg0: i32) -> (i32, i32) {
    %c0_i32 = arith.constant 0 : i32
    %c0_i32_0 = arith.constant 0 : i32
    %c0_i32_1 = arith.constant 0 : i32
    return %c0_i32, %c0_i32_0 : i32, i32
  }
  func.func @transform_7(%arg0: i32) -> (i32, i32) {
    %c0_i32 = arith.constant 0 : i32
    %c0_i32_0 = arith.constant 0 : i32
    return %arg0, %c0_i32 : i32, i32
  }
}

</mosaic_0001>

<bundles_post_ra>
// kernel: tpu_custom_call.1
= control target key start
LH: loop header
LB: loop body
LE: loop exit
PB: predicated region body
PF: predicated region fallthrough
CT: control target
= control target key end

     0   :  { %12 = vsyncpa [#allocation3], 0  ;;  %s678_s0 = inlined_call_operand.hbm [shape: f32[8,16], index: 0, kind: input, shape index: {}]   ;;  %s679_s1 = inlined_call_operand.hbm [shape: f32[16,32], index: 1, kind: input, shape index: {}]   ;;  %s680_s2 = inlined_call_operand.vmem [shape: f32[1,32], index: 2, kind: input, shape index: {}]   ;;  %s681_s3 = inlined_call_operand.hbm [shape: f32[32,32], index: 3, kind: input, shape index: {}]   ;;  %s682_s4 = inlined_call_operand.vmem [shape: f32[1,32], index: 4, kind: input, shape index: {}]   ;;  %s683_s5 = inlined_call_operand.hbm [shape: f32[32,128], index: 5, kind: input, shape index: {}]   ;;  %s684_s6 = inlined_call_operand.vmem [shape: f32[1,128], index: 6, kind: input, shape index: {}]   ;;  %s685_s7 = inlined_call_operand.hbm [shape: f32[8,128], index: 7, kind: output, shape index: {}]  }
   0x1   :  { %13 = vsyncpa [#allocation6], 0 }
   0x2   :  { %14 = vsyncpa [#allocation9], 0 }
   0x3   :  { %15 = vsyncpa [#allocation4], 0  ;;  %s547_s24 = smov [#allocation5]   ;;  %s429_s28 = scalar_lea.hbm %s679_s1, 256 }
   0x4   :  { %s31_s25 = sshll.u32 %s547_s24, 4  ;;  %p430_p0 = scmp.ne.s32.totalorder %s679_s1, %s429_s28  ;;  %s32_s25 = int_to_ptr.vmem [resolvable:$true] %s31_s25 }
   0x5   :  { %p433_p1 = scmp.lt.u32.totalorder %s429_s28, %s679_s1 }
   0x7   :  { %p435_p2 = pnand %p433_p1, %p430_p0 }
   0x9   :  { %438 = shalt.err (!%p435_p2)
}
   0xa   :  { %s439_s10 = scalar_lea.vmem %s32_s25, 256  ;;  %p444_p4 = scmp.lt.s32.totalorder %s32_s25, %s32_s25 }
   0xb   :  { %p440_p3 = scmp.ne.s32.totalorder %s32_s25, %s439_s10  ;;  %p445_p5 = scmp.lt.s32.totalorder %s439_s10, %s439_s10 }
   0xd   :  { %p446_p6 = por %p445_p5, %p444_p4 }
   0xf   :  { %p447_p7 = pnand %p446_p6, %p440_p3 }
  0x11   :  { %450 = shalt.err (!%p447_p7)
}
  0x12   :  { %s548_s11 = smov 128   ;;  %s549_s12 = smov 8  }
  0x13   :  { %37 = dma.hbm_to_vmem [thread:$0]  %s679_s1, 256, %s32_s25, [#allocation6], %s548_s11, %s548_s11, %s549_s12  }
  0x14   :  { %s550_s15 = smov [#allocation2]   ;;  %s551_s17 = smov [#allocation7]  }
  0x15   :  { %s22_s16 = sshll.u32 %s550_s15, 4  ;;  %s45_s18 = sshll.u32 %s551_s17, 4  ;;  %s23_s16 = int_to_ptr.vmem [resolvable:$true] %s22_s16  ;;  %s46_s18 = int_to_ptr.vmem [resolvable:$true] %s45_s18 }
  0x16   :  { %s451_s21 = scalar_lea.hbm %s678_s0, 128 }
  0x17   :  { %p452_p8 = scmp.ne.s32.totalorder %s678_s0, %s451_s21  ;;  %p455_p9 = scmp.lt.u32.totalorder %s451_s21, %s678_s0 }
  0x19   :  { %p457_p10 = pnand %p455_p9, %p452_p8 }
  0x1b   :  { %460 = shalt.err (!%p457_p10)
}
  0x1c   :  { %s461_s1 = scalar_lea.vmem %s23_s16, 128  ;;  %p466_p12 = scmp.lt.s32.totalorder %s23_s16, %s23_s16 }
  0x1d   :  { %p462_p11 = scmp.ne.s32.totalorder %s23_s16, %s461_s1  ;;  %p467_p13 = scmp.lt.s32.totalorder %s461_s1, %s461_s1 }
  0x1f   :  { %p468_p0 = por %p467_p13, %p466_p12 }
  0x21   :  { %p469_p1 = pnand %p468_p0, %p462_p11 }
  0x23   :  { %472 = shalt.err (!%p469_p1)
}
  0x24   :  { %25 = dma.hbm_to_vmem [thread:$0]  %s678_s0, 128, %s23_s16, [#allocation3]  }
  0x25   :  { %s473_s30 = scalar_lea.hbm %s681_s3, 512 }
  0x26   :  { %p474_p2 = scmp.ne.s32.totalorder %s681_s3, %s473_s30  ;;  %p477_p3 = scmp.lt.u32.totalorder %s473_s30, %s681_s3 }
  0x28   :  { %p479_p4 = pnand %p477_p3, %p474_p2 }
  0x2a   :  { %482 = shalt.err (!%p479_p4)
}
  0x2b   :  { %s483_s14 = scalar_lea.vmem %s46_s18, 512  ;;  %p488_p6 = scmp.lt.s32.totalorder %s46_s18, %s46_s18 }
  0x2c   :  { %p484_p5 = scmp.ne.s32.totalorder %s46_s18, %s483_s14  ;;  %p489_p7 = scmp.lt.s32.totalorder %s483_s14, %s483_s14 }
  0x2e   :  { %p490_p8 = por %p489_p7, %p488_p6 }
  0x30   :  { %p491_p9 = pnand %p490_p8, %p484_p5 }
  0x32   :  { %494 = shalt.err (!%p491_p9)
}
  0x33   :  { %51 = dma.hbm_to_vmem [thread:$0]  %s681_s3, 512, %s46_s18, [#allocation6], %s548_s11, %s548_s11, %s549_s12  }
  0x34   :  { %s552_s16 = smov [#allocation8]   ;;  %s495_s21 = scalar_lea.hbm %s683_s5, 512 }
  0x35   :  { %s59_s17 = sshll.u32 %s552_s16, 4  ;;  %p496_p10 = scmp.ne.s32.totalorder %s683_s5, %s495_s21  ;;  %s60_s17 = int_to_ptr.vmem [resolvable:$true] %s59_s17 }
  0x36   :  { %p499_p11 = scmp.lt.u32.totalorder %s495_s21, %s683_s5 }
  0x38   :  { %p501_p12 = pnand %p499_p11, %p496_p10 }
  0x3a   :  { %504 = shalt.err (!%p501_p12)
}
  0x3b   :  { %s505_s1 = scalar_lea.vmem %s60_s17, 512  ;;  %p510_p0 = scmp.lt.s32.totalorder %s60_s17, %s60_s17 }
  0x3c   :  { %p506_p13 = scmp.ne.s32.totalorder %s60_s17, %s505_s1  ;;  %p511_p1 = scmp.lt.s32.totalorder %s505_s1, %s505_s1 }
  0x3e   :  { %p512_p2 = por %p511_p1, %p510_p0 }
  0x40   :  { %p513_p3 = pnand %p512_p2, %p506_p13 }
  0x42   :  { %516 = shalt.err (!%p513_p3)
}
  0x43   :  { %65 = dma.hbm_to_vmem [thread:$0]  %s683_s5, 512, %s60_s17, [#allocation9], %s548_s11, %s548_s11, %s549_s12  }
  0x44   :  { %539 = dma.done.wait [#allocation3], 128  }
  0x45   :  { %540 = vsyncadd [#allocation3], 4294967168 }
  0x46   :  { %541 = dma.done.wait [#allocation6], 768  }
  0x47   :  { %542 = vsyncadd [#allocation6], 4294966528 }
  0x48   :  { %543 = dma.done.wait [#allocation9], 512  }
  0x49   :  { %544 = vsyncadd [#allocation9], 4294966784  ;;  %v553_v0 = vmov 0.0|0.0   ;;  %vm554_vm0 = vmmov 0   ;;  %v555_v1 = vmov 0.0   ;;  %v81_v2 = vld [vmem:[#allocation5] sm:$0xff] }
  0x4a   :  { %402 = vmatprep.subr.bf16.mxu0 %v553_v0  ;;  %377 = vmatprep.mubr.msk.f32.mxu0 %vm554_vm0, %v555_v1  ;;  %v82_v3 = vld [vmem:[#allocation5 + $0x8] sm:$0xff]  ;;  %v165_v5 = vld [vmem:[#allocation7] sm:$0xff]  ;;  %v166_v6 = vld [vmem:[#allocation7 + $0x8] sm:$0xff]  ;;  %vm90_vm1 = vcmask 130048   ;;  %vm176_vm2 = vcmask 261120   ;;  %s556_s28 = smov [#allocation10]  }
  0x4b   :  { %405 = vmatprep.subr.bf16.mxu1 %v553_v0  ;;  %388 = vmatprep.mubr.msk.f32.mxu1 %vm554_vm0, %v555_v1  ;;  %v403_v4 = vpack.c.bf16 %v82_v3, %v81_v2  ;;  %v406_v7 = vpack.c.bf16 %v166_v6, %v165_v5  ;;  %v80_v8 = vld [vmem:[#allocation2] sm:$0xff]  ;;  %v167_v9 = vld [vmem:[#allocation7 + $0x10] sm:$0xff]  ;;  %v168_v10 = vld [vmem:[#allocation7 + $0x18] sm:$0xff]  ;;  %s343_s29 = sshll.u32 %s556_s28, 4  ;;  %s344_s29 = int_to_ptr.vmem [resolvable:$true] %s343_s29 }
  0x4c   :  { %v409_v11 = vpack.c.bf16 %v168_v10, %v167_v9  ;;  %v251_v12 = vld [vmem:[#allocation8] sm:$0xff]  ;;  %v252_v13 = vld [vmem:[#allocation8 + $0x8] sm:$0xff]  ;;  %v253_v20 = vld [vmem:[#allocation8 + $0x10] sm:$0xff]  ;;  %s517_s30 = scalar_lea.vmem %s344_s29, 128  ;;  %p522_p5 = scmp.lt.s32.totalorder %s344_s29, %s344_s29 }
  0x4d   :  { %404 = vmatpush3.bf16.msra.mxu0 %v403_v4  ;;  %407 = vmatpush3.bf16.msra.mxu1 %v406_v7  ;;  %v412_v14 = vpack.c.bf16 %v252_v13, %v251_v12  ;;  %v354_v15 = vld [vmem:[%s680_s2] ss:$0 sm:$0xff]  ;;  %v254_v21 = vld [vmem:[#allocation8 + $0x18] sm:$0xff]  ;;  %p518_p4 = scmp.ne.s32.totalorder %s344_s29, %s517_s30  ;;  %p523_p6 = scmp.lt.s32.totalorder %s517_s30, %s517_s30 }
  0x4e   :  { %411 = vmatprep.subr.bf16.mxu0 %v553_v0  ;;  %408 = vmatprep.subr.bf16.mxu1 %v553_v0  ;;  %v415_v22 = vpack.c.bf16 %v254_v21, %v253_v20  ;;  %v356_v23 = vld [vmem:[%s682_s4] ss:$0 sm:$0xff] }
  0x4f   :  { %v358_v28 = vld [vmem:[%s684_s6] ss:$0 sm:$0xff]  ;;  %p524_p7 = por %p523_p6, %p522_p5 }
  0x50   :  { %378 = vmatmul.mubr.msk.f32.vlgmr.msra.gmra.mrb[0].mxu0 %vm90_vm1, %v80_v8 }
  0x51   :  { %399 = vmatprep.mubr.msk.f32.mxu0 %vm554_vm0, %v555_v1  ;;  %410 = vmatpush3.bf16.msra.mxu1 %v409_v11  ;;  %p525_p8 = pnand %p524_p7, %p518_p4 }
  0x52   :  { %413 = vmatpush3.bf16.msra.mxu0 %v412_v14 }
  0x53   :  { %414 = vmatprep.subr.bf16.mxu0 %v553_v0 }
  0x56   :  { %416 = vmatpush3.bf16.msra.mxu0 %v415_v22 }
 0x123   :  { %v160_v16 = vpop.f32.mrb[0].mxu0 }
 0x124   :  { %v161_v17 = vadd.f32 %v354_v15, %v160_v16  ;;  %v379_v18 = vpop.f32.mrb[1].mxu0 }
 0x126   :  { %v164_v19 = vmax.f32 %v161_v17, 0.0 }
 0x128   :  { %389 = vmatmul.mubr.msk.f32.vlgmr.msra.gmra.mrb[0].mxu1 %vm176_vm2, %v164_v19 }
 0x1fb   :  { %v246_v24 = vpop.f32.mrb[0].mxu1 }
 0x1fc   :  { %v247_v25 = vadd.f32 %v356_v23, %v246_v24  ;;  %v390_v26 = vpop.f32.mrb[1].mxu1 }
 0x1fe   :  { %v250_v27 = vmax.f32 %v247_v25, 0.0 }
 0x200   :  { %400 = vmatmul.mubr.msk.f32.vlgmr.msra.gmra.mrb[2].mxu0 %vm176_vm2, %v250_v27 }
 0x2d3   :  { %v331_v29 = vpop.f32.mrb[2].mxu0 }
 0x2d4   :  { %v332_v30 = vadd.f32 %v358_v28, %v331_v29  ;;  %v401_v31 = vpop.f32.mrb[3].mxu0 }
 0x2d6   :  { %427 = vtanh.f32 %v332_v30 }
 0x2e0   :  { %v428_v32 = vpop.eup %427 }
 0x2e1   :  { %336 = vst [vmem:[#allocation10] sm:$0xff] %v428_v32 }
 0x2e2   :  { %528 = shalt.err (!%p525_p8)
}
 0x2e3   :  { %s529_s6 = scalar_lea.hbm %s685_s7, 128 }
 0x2e4   :  { %p530_p9 = scmp.ne.s32.totalorder %s685_s7, %s529_s6  ;;  %p533_p10 = scmp.lt.u32.totalorder %s529_s6, %s685_s7 }
 0x2e6   :  { %p535_p11 = pnand %p533_p10, %p530_p9 }
 0x2e8   :  { %538 = shalt.err (!%p535_p11)
}
 0x2e9   :  { %346 = dma.vmem_to_hbm [thread:$0]  %s344_s29, 128, %s685_s7, [#allocation4]  }
 0x2ea   :  { %545 = dma.done.wait [#allocation4], 128  }
 0x2eb   :  { %546 = vsyncadd [#allocation4], 4294967168 }
 0x2ec   :  { %350 = vsyncpa [#allocation3], 1 }
 0x2ed   :  { %351 = vsyncpa [#allocation6], 1 }
 0x2ee   :  { %352 = vsyncpa [#allocation9], 1 }
 0x2ef   :  { %353 = vsyncpa [#allocation4], 1 }

</bundles_post_ra>
